<compile_context>
chip_gen: v5e
topology: v5e:2x2
jax: 0.10.0
libtpu: 0.0.40
codegen_flags: <defaults>
</compile_context>

<pallas_src>
import functools

import jax
import jax.numpy as jnp
from jax.experimental import pallas as pl
from jax.experimental.pallas import tpu as pltpu


def _round_up(v, m):
    return (v + m - 1) // m * m


def _pick_divisor_tile(total, unit, max_tile):
    """Largest multiple of `unit` that divides `total` and is <= max_tile."""
    best = unit
    t = unit
    lim = min(total, max_tile)
    while t <= lim:
        if total % t == 0:
            best = t
        t += unit
    return best


def _ff_kernel(x_ref, g_ref, b_ref, w1_ref, b1_ref, w2_ref, b2_ref, o_ref,
               xn_ref, acc_ref, *, eps, d_true, d_pad):
    k = pl.program_id(1)

    # ---- LayerNorm once per token tile; cache bf16 result for all k steps ----
    @pl.when(k == 0)
    def _():
        x = x_ref[...].astype(jnp.float32)
        inv_d = jnp.float32(1.0 / d_true)
        mean = jnp.sum(x, axis=-1, keepdims=True) * inv_d
        centered = x - mean
        sq = jnp.sum(centered * centered, axis=-1, keepdims=True)
        if d_pad != d_true:
            # Padded x columns are zero, so centered there is exactly -mean:
            # subtract the scalar correction instead of masking with iota/where.
            sq = sq - jnp.float32(d_pad - d_true) * (mean * mean)
        var = jnp.maximum(sq * inv_d, 0.0)
        xn = centered * jax.lax.rsqrt(var + jnp.float32(eps))
        # gamma/beta are zero-padded -> padded columns of xn are exactly 0.
        xn = xn * g_ref[...].astype(jnp.float32) + b_ref[...].astype(jnp.float32)
        xn_ref[...] = xn.astype(xn_ref.dtype)
        acc_ref[...] = jnp.zeros_like(acc_ref)

    # ---- Linear(dim -> hidden chunk): bf16 operands, f32 MXU accumulation ----
    h = jnp.dot(xn_ref[...], w1_ref[...], preferred_element_type=jnp.float32)
    h = h + b1_ref[...].astype(jnp.float32)

    # ---- GELU (exact, erf-based — torch.nn.GELU default) ----
    h = 0.5 * h * (1.0 + jax.lax.erf(h * jnp.float32(0.7071067811865476)))

    # ---- Linear(hidden chunk -> dim): accumulate into resident f32 scratch ----
    acc_ref[...] += jnp.dot(h.astype(w2_ref.dtype), w2_ref[...],
                            preferred_element_type=jnp.float32)

    @pl.when(k == pl.num_programs(1) - 1)
    def _():
        o_ref[...] = (acc_ref[...]
                      + b2_ref[...].astype(jnp.float32)).astype(o_ref.dtype)


def feed_forward(x, gamma, beta, w1, b1, w2, b2, *, eps=1e-5,
                 param_dtype=jnp.bfloat16):
    """x: (batch, seq, dim); w1: (dim, hidden); w2: (hidden, dim) — (in, out)."""
    batch, seq, dim = x.shape
    hidden = w1.shape[1]
    m = batch * seq

    x_bytes = jnp.dtype(x.dtype).itemsize
    w_bytes = jnp.dtype(param_dtype).itemsize
    sub = {4: 8, 2: 16, 1: 32}.get(x_bytes, 8)     # sublane packing of x dtype

    # Lane-dense, 256-aligned feature/hidden axes (256-wide MXUs on v6e/v7x).
    d_pad = _round_up(dim, 256)
    h_pad = _round_up(hidden, 256)

    # Generation-aware VMEM budget (~100 MiB on 128 MiB parts, ~85% on v7x).
    cap = 64 * 2 ** 20
    try:
        info = pltpu.get_tpu_info()
        cap = int(getattr(info, "vmem_capacity_bytes", cap) or cap)
    except Exception:
        pass
    budget = int(min(cap * 0.85, 100 * 2 ** 20))

    # Hidden tile: largest 256-multiple divisor of h_pad <= 2048, shrunk until
    # the double-buffered streamed W1/W2 blocks use at most half the budget.
    th = _pick_divisor_tile(h_pad, 256, 2048)
    while th > 256 and 4 * d_pad * th * w_bytes > budget // 2:
        if h_pad % (th // 2) != 0:
            break
        th //= 2

    def est_vmem(tm_):
        return (2 * tm_ * d_pad * x_bytes            # x tile, double-buffered
                + 2 * tm_ * d_pad * x_bytes          # out tile, double-buffered
                + 4 * d_pad * th * w_bytes           # W1 + W2 blocks, 2 bufs each
                + tm_ * d_pad * (w_bytes + 4)        # xn + acc scratch
                + 2 * tm_ * th * 4                   # GELU intermediate headroom
                + 8 * (d_pad + th) * 4)              # LN params / biases

    # Token tile: largest power of two <= 512 that fits the budget and m.
    tm = 512
    while tm > sub and (tm > _round_up(m, sub) or est_vmem(tm) > budget):
        tm //= 2
    tm = max(_round_up(tm, sub), sub)
    m_pad = _round_up(m, tm)

    x2 = x.reshape(m, dim)
    if (m_pad, d_pad) != (m, dim):
        x2 = jnp.pad(x2, ((0, m_pad - m), (0, d_pad - dim)))

    def _pad_row(v, n):
        v = v.astype(jnp.float32)
        if v.shape[0] != n:
            v = jnp.pad(v, (0, n - v.shape[0]))
        return v.reshape(1, n)

    gamma2 = _pad_row(gamma, d_pad)   # zero padding -> padded xn columns are 0
    beta2 = _pad_row(beta, d_pad)
    b1_2 = _pad_row(b1, h_pad)
    b2_2 = _pad_row(b2, d_pad)

    w1p, w2p = w1, w2
    if (d_pad, h_pad) != (dim, hidden):
        w1p = jnp.pad(w1, ((0, d_pad - dim), (0, h_pad - hidden)))
        w2p = jnp.pad(w2, ((0, h_pad - hidden), (0, d_pad - dim)))
    w1p = w1p.astype(param_dtype)
    w2p = w2p.astype(param_dtype)

    kernel = functools.partial(_ff_kernel, eps=eps, d_true=dim, d_pad=d_pad)

    cost = pl.CostEstimate(
        flops=int(4 * m * dim * hidden + 10 * m * dim),
        transcendentals=int(m * hidden),
        bytes_accessed=int(2 * m * dim * x_bytes
                           + 2 * dim * hidden * w_bytes
                           + (3 * dim + hidden) * 4),
    )

    out = pl.pallas_call(
        kernel,
        out_shape=jax.ShapeDtypeStruct((m_pad, d_pad), x.dtype),
        grid_spec=pltpu.PrefetchScalarGridSpec(
            num_scalar_prefetch=0,
            grid=(m_pad // tm, h_pad // th),
            in_specs=[
                pl.BlockSpec((tm, d_pad), lambda i, k: (i, 0)),    # x tile
                pl.BlockSpec((1, d_pad), lambda i, k: (0, 0)),     # gamma
                pl.BlockSpec((1, d_pad), lambda i, k: (0, 0)),     # beta
                pl.BlockSpec((d_pad, th), lambda i, k: (0, k)),    # W1 chunk
                pl.BlockSpec((1, th), lambda i, k: (0, k)),        # b1 chunk
                pl.BlockSpec((th, d_pad), lambda i, k: (k, 0)),    # W2 chunk
                pl.BlockSpec((1, d_pad), lambda i, k: (0, 0)),     # b2
            ],
            out_specs=pl.BlockSpec((tm, d_pad), lambda i, k: (i, 0)),
            scratch_shapes=[
                pltpu.VMEM((tm, d_pad), param_dtype),   # cached LN output (bf16)
                pltpu.VMEM((tm, d_pad), jnp.float32),   # second-matmul accumulator
            ],
        ),
        compiler_params=pltpu.CompilerParams(
            dimension_semantics=("parallel", "arbitrary"),
            vmem_limit_bytes=budget,
        ),
        cost_estimate=cost,
    )(x2, gamma2, beta2, w1p, b1_2, w2p, b2_2)

    return out[:m, :dim].reshape(batch, seq, dim)


def _reference(x, gamma, beta, w1, b1, w2, b2, eps=1e-5, dot_dtype=None):
    xf = x.astype(jnp.float32)
    mean = jnp.mean(xf, axis=-1, keepdims=True)
    var = jnp.mean((xf - mean) ** 2, axis=-1, keepdims=True)
    xn = (xf - mean) * jax.lax.rsqrt(var + eps) * gamma + beta
    if dot_dtype is not None:
        h = jnp.dot(xn.astype(dot_dtype), w1.astype(dot_dtype),
                    preferred_element_type=jnp.float32) + b1
    else:
        h = xn @ w1 + b1
    h = 0.5 * h * (1.0 + jax.lax.erf(h / jnp.sqrt(2.0)))
    if dot_dtype is not None:
        y = jnp.dot(h.astype(dot_dtype), w2.astype(dot_dtype),
                    preferred_element_type=jnp.float32) + b2
    else:
        y = h @ w2 + b2
    return y


if __name__ == "__main__":
    key = jax.random.PRNGKey(0)
    batch, seq, dim, hidden = 2, 8, 32, 64

    k_x, k_w1, k_b1, k_w2, k_b2, k_g, k_bt = jax.random.split(key, 7)

    x = jax.random.normal(k_x, (batch, seq, dim), dtype=jnp.float32)

    # LayerNorm affine params (non-trivial to exercise the affine path).
    gamma = 1.0 + 0.1 * jax.random.normal(k_g, (dim,), dtype=jnp.float32)
    beta = 0.1 * jax.random.normal(k_bt, (dim,), dtype=jnp.float32)
    # nn.Linear weights are (out, in) in PyTorch; stored transposed (in, out).
    w1 = jax.random.normal(k_w1, (dim, hidden), dtype=jnp.float32) * 0.05
    b1 = jax.random.normal(k_b1, (hidden,), dtype=jnp.float32) * 0.01
    w2 = jax.random.normal(k_w2, (hidden, dim), dtype=jnp.float32) * 0.05
    b2 = jax.random.normal(k_b2, (dim,), dtype=jnp.float32) * 0.01

    out = feed_forward(x, gamma, beta, w1, b1, w2, b2)
    out = jax.block_until_ready(out)
    assert out.shape == (batch, seq, dim)

    # Tight check against a matched-precision (bf16 dot operands, f32 accum)
    # reference, and a looser check against the full-f32 PyTorch-equivalent.
    ref_match = _reference(x, gamma, beta, w1, b1, w2, b2, dot_dtype=jnp.bfloat16)
    ref_f32 = _reference(x, gamma, beta, w1, b1, w2, b2)
    assert jnp.allclose(out, ref_match, atol=5e-3, rtol=5e-3), \
        float(jnp.max(jnp.abs(out - ref_match)))
    assert jnp.allclose(out, ref_f32, atol=3e-2, rtol=3e-2), \
        float(jnp.max(jnp.abs(out - ref_f32)))

    print("KERNEL_OK")
</pallas_src>

<mosaic_0001>
module attributes {stable_mosaic.version = 11 : i64} {
  func.func @_ff_kernel(%arg0: i32, %arg1: i32, %arg2: memref<16x256xf32, #tpu.memory_space<vmem>>, %arg3: memref<1x256xf32, #tpu.memory_space<vmem>>, %arg4: memref<1x256xf32, #tpu.memory_space<vmem>>, %arg5: memref<256x256xbf16, #tpu.memory_space<vmem>>, %arg6: memref<1x256xf32, #tpu.memory_space<vmem>>, %arg7: memref<256x256xbf16, #tpu.memory_space<vmem>>, %arg8: memref<1x256xf32, #tpu.memory_space<vmem>>, %arg9: memref<16x256xf32, #tpu.memory_space<vmem>>, %arg10: memref<16x256xbf16, #tpu.memory_space<vmem>>, %arg11: memref<16x256xf32, #tpu.memory_space<vmem>>) attributes {dimension_semantics = [#tpu.dimension_semantics<parallel>, #tpu.dimension_semantics<arbitrary>], iteration_bounds = array<i64: 1, 1>, scalar_prefetch = 0 : i64, scratch_operands = 2 : i64, tpu.core_type = #tpu.core_type<tc>, window_params = [{transform_indices = @transform_0, window_bounds = array<i64: 16, 256>}, {pipeline_mode = #tpu.pipeline_mode<synchronous>, transform_indices = @transform_1, window_bounds = array<i64: 1, 256>}, {pipeline_mode = #tpu.pipeline_mode<synchronous>, transform_indices = @transform_2, window_bounds = array<i64: 1, 256>}, {transform_indices = @transform_3, window_bounds = array<i64: 256, 256>}, {transform_indices = @transform_4, window_bounds = array<i64: 1, 256>}, {transform_indices = @transform_5, window_bounds = array<i64: 256, 256>}, {pipeline_mode = #tpu.pipeline_mode<synchronous>, transform_indices = @transform_6, window_bounds = array<i64: 1, 256>}, {transform_indices = @transform_7, window_bounds = array<i64: 16, 256>}]} {
    %c0_i32 = arith.constant 0 : i32
    %0 = arith.cmpi eq, %arg1, %c0_i32 : i32
    %1 = arith.extui %0 : i1 to i32
    %c0_i32_0 = arith.constant 0 : i32
    %2 = arith.cmpi ne, %1, %c0_i32_0 : i32
    scf.if %2 {
      %c0_18 = arith.constant 0 : index
      %c0_19 = arith.constant 0 : index
      %26 = vector.load %arg2[%c0_18, %c0_19] : memref<16x256xf32, #tpu.memory_space<vmem>>, vector<16x256xf32>
      %cst_20 = arith.constant dense<0.000000e+00> : vector<16xf32>
      %27 = vector.multi_reduction <add>, %26, %cst_20 [1] : vector<16x256xf32> to vector<16xf32>
      %28 = vector.shape_cast %27 : vector<16xf32> to vector<16x1xf32>
      %cst_21 = arith.constant 3.125000e-02 : f32
      %29 = vector.broadcast %cst_21 : f32 to vector<16x1xf32>
      %30 = arith.mulf %28, %29 : vector<16x1xf32>
      %31 = vector.broadcast %30 : vector<16x1xf32> to vector<16x256xf32>
      %32 = arith.subf %26, %31 : vector<16x256xf32>
      %33 = arith.mulf %32, %32 : vector<16x256xf32>
      %cst_22 = arith.constant dense<0.000000e+00> : vector<16xf32>
      %34 = vector.multi_reduction <add>, %33, %cst_22 [1] : vector<16x256xf32> to vector<16xf32>
      %35 = vector.shape_cast %34 : vector<16xf32> to vector<16x1xf32>
      %36 = arith.mulf %30, %30 : vector<16x1xf32>
      %cst_23 = arith.constant 2.240000e+02 : f32
      %37 = vector.broadcast %cst_23 : f32 to vector<16x1xf32>
      %38 = arith.mulf %37, %36 : vector<16x1xf32>
      %39 = arith.subf %35, %38 : vector<16x1xf32>
      %cst_24 = arith.constant 3.125000e-02 : f32
      %40 = vector.broadcast %cst_24 : f32 to vector<16x1xf32>
      %41 = arith.mulf %39, %40 : vector<16x1xf32>
      %cst_25 = arith.constant 0.000000e+00 : f32
      %42 = vector.broadcast %cst_25 : f32 to vector<16x1xf32>
      %43 = arith.maximumf %41, %42 : vector<16x1xf32>
      %cst_26 = arith.constant 9.99999974E-6 : f32
      %44 = vector.broadcast %cst_26 : f32 to vector<16x1xf32>
      %45 = arith.addf %43, %44 : vector<16x1xf32>
      %46 = math.rsqrt %45 : vector<16x1xf32>
      %47 = vector.broadcast %46 : vector<16x1xf32> to vector<16x256xf32>
      %48 = arith.mulf %32, %47 : vector<16x256xf32>
      %c0_27 = arith.constant 0 : index
      %c0_28 = arith.constant 0 : index
      %49 = vector.load %arg3[%c0_27, %c0_28] : memref<1x256xf32, #tpu.memory_space<vmem>>, vector<1x256xf32>
      %50 = vector.broadcast %49 : vector<1x256xf32> to vector<16x256xf32>
      %51 = arith.mulf %48, %50 : vector<16x256xf32>
      %c0_29 = arith.constant 0 : index
      %c0_30 = arith.constant 0 : index
      %52 = vector.load %arg4[%c0_29, %c0_30] : memref<1x256xf32, #tpu.memory_space<vmem>>, vector<1x256xf32>
      %53 = vector.broadcast %52 : vector<1x256xf32> to vector<16x256xf32>
      %54 = arith.addf %51, %53 : vector<16x256xf32>
      %55 = arith.truncf %54 : vector<16x256xf32> to vector<16x256xbf16>
      %c0_31 = arith.constant 0 : index
      %c0_32 = arith.constant 0 : index
      %56 = vector.load %arg10[%c0_31, %c0_32] : memref<16x256xbf16, #tpu.memory_space<vmem>>, vector<16x256xbf16>
      tpu.vector_store %arg10[%c0_31, %c0_32], %55 {strides = array<i32>} : memref<16x256xbf16, #tpu.memory_space<vmem>>, vector<16x256xbf16>,
      %cst_33 = arith.constant 0.000000e+00 : f32
      %57 = vector.broadcast %cst_33 : f32 to vector<16x256xf32>
      %c0_34 = arith.constant 0 : index
      %c0_35 = arith.constant 0 : index
      %58 = vector.load %arg11[%c0_34, %c0_35] : memref<16x256xf32, #tpu.memory_space<vmem>>, vector<16x256xf32>
      tpu.vector_store %arg11[%c0_34, %c0_35], %57 {strides = array<i32>} : memref<16x256xf32, #tpu.memory_space<vmem>>, vector<16x256xf32>,
    } else {
    }
    %c0 = arith.constant 0 : index
    %c0_1 = arith.constant 0 : index
    %3 = vector.load %arg10[%c0, %c0_1] : memref<16x256xbf16, #tpu.memory_space<vmem>>, vector<16x256xbf16>
    %c0_2 = arith.constant 0 : index
    %c0_3 = arith.constant 0 : index
    %4 = vector.load %arg5[%c0_2, %c0_3] : memref<256x256xbf16, #tpu.memory_space<vmem>>, vector<256x256xbf16>
    %cst = arith.constant dense<0.000000e+00> : vector<16x256xf32>
    %5 = tpu.matmul %3, %4, %cst {dimension_numbers = #tpu.dot_dimension_numbers<[1], [0], [0], [1], [0, 0, 1, 1], [], []>} : vector<16x256xbf16>, vector<256x256xbf16>, vector<16x256xf32> -> vector<16x256xf32>
    %c0_4 = arith.constant 0 : index
    %c0_5 = arith.constant 0 : index
    %6 = vector.load %arg6[%c0_4, %c0_5] : memref<1x256xf32, #tpu.memory_space<vmem>>, vector<1x256xf32>
    %7 = vector.broadcast %6 : vector<1x256xf32> to vector<16x256xf32>
    %8 = arith.addf %5, %7 : vector<16x256xf32>
    %cst_6 = arith.constant 5.000000e-01 : f32
    %9 = vector.broadcast %cst_6 : f32 to vector<16x256xf32>
    %10 = arith.mulf %9, %8 : vector<16x256xf32>
    %cst_7 = arith.constant 0.707106769 : f32
    %11 = vector.broadcast %cst_7 : f32 to vector<16x256xf32>
    %12 = arith.mulf %8, %11 : vector<16x256xf32>
    %13 = math.erf %12 : vector<16x256xf32>
    %cst_8 = arith.constant 1.000000e+00 : f32
    %14 = vector.broadcast %cst_8 : f32 to vector<16x256xf32>
    %15 = arith.addf %14, %13 : vector<16x256xf32>
    %16 = arith.mulf %10, %15 : vector<16x256xf32>
    %c0_9 = arith.constant 0 : index
    %c0_10 = arith.constant 0 : index
    %17 = vector.load %arg11[%c0_9, %c0_10] : memref<16x256xf32, #tpu.memory_space<vmem>>, vector<16x256xf32>
    %18 = arith.truncf %16 : vector<16x256xf32> to vector<16x256xbf16>
    %c0_11 = arith.constant 0 : index
    %c0_12 = arith.constant 0 : index
    %19 = vector.load %arg7[%c0_11, %c0_12] : memref<256x256xbf16, #tpu.memory_space<vmem>>, vector<256x256xbf16>
    %cst_13 = arith.constant dense<0.000000e+00> : vector<16x256xf32>
    %20 = tpu.matmul %18, %19, %cst_13 {dimension_numbers = #tpu.dot_dimension_numbers<[1], [0], [0], [1], [0, 0, 1, 1], [], []>} : vector<16x256xbf16>, vector<256x256xbf16>, vector<16x256xf32> -> vector<16x256xf32>
    %21 = arith.addf %17, %20 : vector<16x256xf32>
    %c0_14 = arith.constant 0 : index
    %c0_15 = arith.constant 0 : index
    %22 = vector.load %arg11[%c0_14, %c0_15] : memref<16x256xf32, #tpu.memory_space<vmem>>, vector<16x256xf32>
    tpu.vector_store %arg11[%c0_14, %c0_15], %21 {strides = array<i32>} : memref<16x256xf32, #tpu.memory_space<vmem>>, vector<16x256xf32>,
    %c0_i32_16 = arith.constant 0 : i32
    %23 = arith.cmpi eq, %arg1, %c0_i32_16 : i32
    %24 = arith.extui %23 : i1 to i32
    %c0_i32_17 = arith.constant 0 : i32
    %25 = arith.cmpi ne, %24, %c0_i32_17 : i32
    scf.if %25 {
      %c0_18 = arith.constant 0 : index
      %c0_19 = arith.constant 0 : index
      %26 = vector.load %arg11[%c0_18, %c0_19] : memref<16x256xf32, #tpu.memory_space<vmem>>, vector<16x256xf32>
      %c0_20 = arith.constant 0 : index
      %c0_21 = arith.constant 0 : index
      %27 = vector.load %arg8[%c0_20, %c0_21] : memref<1x256xf32, #tpu.memory_space<vmem>>, vector<1x256xf32>
      %28 = vector.broadcast %27 : vector<1x256xf32> to vector<16x256xf32>
      %29 = arith.addf %26, %28 : vector<16x256xf32>
      %c0_22 = arith.constant 0 : index
      %c0_23 = arith.constant 0 : index
      %30 = vector.load %arg9[%c0_22, %c0_23] : memref<16x256xf32, #tpu.memory_space<vmem>>, vector<16x256xf32>
      tpu.vector_store %arg9[%c0_22, %c0_23], %29 {strides = array<i32>} : memref<16x256xf32, #tpu.memory_space<vmem>>, vector<16x256xf32>,
    } else {
    }
    return
  }
  func.func @transform_0(%arg0: i32, %arg1: i32) -> (i32, i32) {
    %c0_i32 = arith.constant 0 : i32
    %c0_i32_0 = arith.constant 0 : i32
    return %arg0, %c0_i32 : i32, i32
  }
  func.func @transform_1(%arg0: i32, %arg1: i32) -> (i32, i32) {
    %c0_i32 = arith.constant 0 : i32
    %c0_i32_0 = arith.constant 0 : i32
    %c0_i32_1 = arith.constant 0 : i32
    return %c0_i32, %c0_i32_0 : i32, i32
  }
  func.func @transform_2(%arg0: i32, %arg1: i32) -> (i32, i32) {
    %c0_i32 = arith.constant 0 : i32
    %c0_i32_0 = arith.constant 0 : i32
    %c0_i32_1 = arith.constant 0 : i32
    return %c0_i32, %c0_i32_0 : i32, i32
  }
  func.func @transform_3(%arg0: i32, %arg1: i32) -> (i32, i32) {
    %c0_i32 = arith.constant 0 : i32
    %c0_i32_0 = arith.constant 0 : i32
    return %c0_i32, %arg1 : i32, i32
  }
  func.func @transform_4(%arg0: i32, %arg1: i32) -> (i32, i32) {
    %c0_i32 = arith.constant 0 : i32
    %c0_i32_0 = arith.constant 0 : i32
    return %c0_i32, %arg1 : i32, i32
  }
  func.func @transform_5(%arg0: i32, %arg1: i32) -> (i32, i32) {
    %c0_i32 = arith.constant 0 : i32
    %c0_i32_0 = arith.constant 0 : i32
    return %arg1, %c0_i32 : i32, i32
  }
  func.func @transform_6(%arg0: i32, %arg1: i32) -> (i32, i32) {
    %c0_i32 = arith.constant 0 : i32
    %c0_i32_0 = arith.constant 0 : i32
    %c0_i32_1 = arith.constant 0 : i32
    return %c0_i32, %c0_i32_0 : i32, i32
  }
  func.func @transform_7(%arg0: i32, %arg1: i32) -> (i32, i32) {
    %c0_i32 = arith.constant 0 : i32
    %c0_i32_0 = arith.constant 0 : i32
    return %arg0, %c0_i32 : i32, i32
  }
}

</mosaic_0001>

<bundles_post_ra>
// kernel: tpu_custom_call.1
= control target key start
LH: loop header
LB: loop body
LE: loop exit
PB: predicated region body
PF: predicated region fallthrough
CT: control target
= control target key end

     0   :  { %12 = vsyncpa [#allocation5], 0  ;;  %s1718_s0 = inlined_call_operand.hbm [shape: f32[16,256], index: 0, kind: input, shape index: {}]   ;;  %s1719_s1 = inlined_call_operand.hbm [shape: f32[1,256], index: 1, kind: input, shape index: {}]   ;;  %s1720_s2 = inlined_call_operand.hbm [shape: f32[1,256], index: 2, kind: input, shape index: {}]   ;;  %s1721_s3 = inlined_call_operand.hbm [shape: bf16[256,256], index: 3, kind: input, shape index: {}]   ;;  %s1722_s4 = inlined_call_operand.vmem [shape: f32[1,256], index: 4, kind: input, shape index: {}]   ;;  %s1723_s5 = inlined_call_operand.hbm [shape: bf16[256,256], index: 5, kind: input, shape index: {}]   ;;  %s1724_s6 = inlined_call_operand.vmem [shape: f32[1,256], index: 6, kind: input, shape index: {}]   ;;  %s1725_s7 = inlined_call_operand.hbm [shape: f32[16,256], index: 7, kind: output, shape index: {}]  }
   0x1   :  { %13 = vsyncpa [#allocation8], 0 }
   0x2   :  { %14 = vsyncpa [#allocation11], 0  ;;  %s34_s26 = sshll.u32 %s1719_s1, 4  ;;  %s35_s26 = int_to_ptr.hbm [resolvable:$true] %s34_s26 }
   0x3   :  { %15 = vsyncpa [#allocation6], 0  ;;  %s1449_s27 = smov [#allocation7]   ;;  %s55_s8 = sshll.u32 %s1721_s3, 4  ;;  %s56_s8 = int_to_ptr.hbm [resolvable:$true] %s55_s8 }
   0x4   :  { %s36_s28 = sshll.u32 %s1449_s27, 4  ;;  %s1450_s9 = smov [#allocation10]   ;;  %s37_s28 = int_to_ptr.vmem [resolvable:$true] %s36_s28 }
   0x5   :  { %39 = dma.hbm_to_vmem [thread:$0]  %s35_s26, 32, %s37_s28, [#allocation8]  }
   0x6   :  { %s57_s10 = sshll.u32 %s1450_s9, 4  ;;  %s1451_s11 = smov 128   ;;  %s58_s10 = int_to_ptr.vmem [resolvable:$true] %s57_s10 }
   0x7   :  { %s1452_s12 = smov 8   ;;  %s20_s1 = sshll.u32 %s1718_s0, 4  ;;  %s21_s1 = int_to_ptr.hbm [resolvable:$true] %s20_s1 }
   0x8   :  { %63 = dma.hbm_to_vmem [thread:$0]  %s56_s8, 4096, %s58_s10, [#allocation11], %s1451_s11, %s1451_s11, %s1452_s12  }
   0x9   :  { %s1453_s15 = smov [#allocation4]   ;;  %s45_s3 = sshll.u32 %s1720_s2, 4  ;;  %s46_s3 = int_to_ptr.hbm [resolvable:$true] %s45_s3 }
   0xa   :  { %s22_s16 = sshll.u32 %s1453_s15, 4  ;;  %s1454_s19 = smov 256   ;;  %s23_s16 = int_to_ptr.vmem [resolvable:$true] %s22_s16 }
   0xb   :  { %s1455_s20 = smov 16   ;;  %s1456_s21 = smov [#allocation9]  }
   0xc   :  { %28 = dma.hbm_to_vmem [thread:$0]  %s21_s1, 512, %s23_s16, [#allocation5], %s1454_s19, %s1454_s19, %s1455_s20  }
   0xd   :  { %s47_s22 = sshll.u32 %s1456_s21, 4  ;;  %s70_s0 = sshll.u32 %s1723_s5, 4  ;;  %s48_s22 = int_to_ptr.vmem [resolvable:$true] %s47_s22  ;;  %s71_s0 = int_to_ptr.hbm [resolvable:$true] %s70_s0 }
   0xe   :  { %50 = dma.hbm_to_vmem [thread:$0]  %s46_s3, 32, %s48_s22, [#allocation8]  }
   0xf   :  { %s1457_s25 = smov [#allocation12]  }
  0x10   :  { %s72_s26 = sshll.u32 %s1457_s25, 4  ;;  %s73_s26 = int_to_ptr.vmem [resolvable:$true] %s72_s26 }
  0x11   :  { %78 = dma.hbm_to_vmem [thread:$0]  %s71_s0, 4096, %s73_s26, [#allocation11], %s1451_s11, %s1451_s11, %s1452_s12  }
  0x12   :  { %1441 = dma.done.wait [#allocation5], 512  }
  0x13   :  { %1442 = vsyncadd [#allocation5], 4294966784 }
  0x14   :  { %1443 = dma.done.wait [#allocation8], 64  }
  0x15   :  { %1444 = vsyncadd [#allocation8], 4294967232 }
  0x16   :  { %1445 = dma.done.wait [#allocation11], 8192  }
  0x17   :  { %1446 = vsyncadd [#allocation11], 4294959104  ;;  %v105_v0 = vld [vmem:[#allocation4] sm:$0xff]  ;;  %v106_v1 = vld [vmem:[#allocation4 + $0x8] sm:$0xff]  ;;  %s926_s8 = sshll.u32 %s1725_s7, 4  ;;  %s927_s8 = int_to_ptr.hbm [resolvable:$true] %s926_s8 }
  0x18   :  { %v109_v2 = vadd.f32 %v106_v1, %v105_v0  ;;  %v107_v3 = vld [vmem:[#allocation4 + $0x10] sm:$0xff]  ;;  %v108_v4 = vld [vmem:[#allocation4 + $0x18] sm:$0xff]  ;;  %v1009_v26 = vld [vmem:[#allocation10 + $0x78] sm:$0xf0] }
  0x19   :  { %v112_v5 = vadd.f32 %v108_v4, %v107_v3  ;;  %v1007_v20 = vld [vmem:[#allocation10 + $0x70] sm:$0xf]  ;;  %v1226_v21 = vld [vmem:[#allocation10 + $0x74] sm:$0xf0]  ;;  %v1225_v25 = vld [vmem:[#allocation10 + $0x74] sm:$0xf] }
  0x1a   :  { %110 = vadd.xlane.f32.xlu0 %v109_v2  ;;  %v1071_v22 = vld [vmem:[#allocation10 + $0xf0] sm:$0xf]  ;;  %v1008_v23 = vor.u32 %v1226_v21, %v1007_v20  ;;  %v1242_v24 = vld [vmem:[#allocation10 + $0xf4] sm:$0xf0]  ;;  %v1012_v28 = vor.u32 %v1225_v25, %v1009_v26  ;;  %v1241_v29 = vld [vmem:[#allocation10 + $0xf4] sm:$0xf] }
  0x1b   :  { %v1072_v27 = vor.u32 %v1242_v24, %v1071_v22  ;;  %v1073_v30 = vld [vmem:[#allocation10 + $0xf8] sm:$0xf0]  ;;  %v999_v32 = vld [vmem:[#allocation10 + $0x60] sm:$0xf]  ;;  %v1224_v33 = vld [vmem:[#allocation10 + $0x64] sm:$0xf0] }
  0x1c   :  { %405 = vmatpush.bf16.msra.mxu0 %v1008_v23  ;;  %v1076_v31 = vor.u32 %v1241_v29, %v1073_v30  ;;  %433 = vmatpush.bf16.msra.mxu2 %v1012_v28  ;;  %v1063_v34 = vld [vmem:[#allocation10 + $0xe0] sm:$0xf]  ;;  %v1000_v35 = vor.u32 %v1224_v33, %v999_v32  ;;  %v1240_v36 = vld [vmem:[#allocation10 + $0xe4] sm:$0xf0]  ;;  %v1223_v37 = vld [vmem:[#allocation10 + $0x64] sm:$0xf] }
  0x1d   :  { %419 = vmatpush.bf16.msra.mxu1 %v1072_v27  ;;  %v1001_v38 = vld [vmem:[#allocation10 + $0x68] sm:$0xf0]  ;;  %v1064_v39 = vor.u32 %v1240_v36, %v1063_v34  ;;  %v1239_v41 = vld [vmem:[#allocation10 + $0xe4] sm:$0xf]  ;;  %v991_v45 = vld [vmem:[#allocation10 + $0x50] sm:$0xf] }
  0x1e   :  { %447 = vmatpush.bf16.msra.mxu3 %v1076_v31  ;;  %v1004_v40 = vor.u32 %v1223_v37, %v1001_v38  ;;  %v1065_v42 = vld [vmem:[#allocation10 + $0xe8] sm:$0xf0]  ;;  %v1222_v46 = vld [vmem:[#allocation10 + $0x54] sm:$0xf0]  ;;  %v1055_v47 = vld [vmem:[#allocation10 + $0xd0] sm:$0xf] }
  0x1f   :  { %v1068_v44 = vor.u32 %v1239_v41, %v1065_v42  ;;  %v992_v48 = vor.u32 %v1222_v46, %v991_v45  ;;  %v1238_v49 = vld [vmem:[#allocation10 + $0xd4] sm:$0xf0]  ;;  %v1221_v50 = vld [vmem:[#allocation10 + $0x54] sm:$0xf]  ;;  %v993_v51 = vld [vmem:[#allocation10 + $0x58] sm:$0xf0] }
  0x20   :  { %406 = vmatpush.bf16.msra.mxu0 %v1000_v35  ;;  %434 = vmatpush.bf16.msra.mxu2 %v1004_v40  ;;  %v1056_v52 = vor.u32 %v1238_v49, %v1055_v47  ;;  %v996_v53 = vor.u32 %v1221_v50, %v993_v51  ;;  %v1237_v54 = vld [vmem:[#allocation10 + $0xd4] sm:$0xf]  ;;  %v1057_v55 = vld [vmem:[#allocation10 + $0xd8] sm:$0xf0]  ;;  %v983_v58 = vld [vmem:[#allocation10 + $0x40] sm:$0xf] }
  0x21   :  { %420 = vmatpush.bf16.msra.mxu1 %v1064_v39  ;;  %v1060_v57 = vor.u32 %v1237_v54, %v1057_v55  ;;  %v1220_v59 = vld [vmem:[#allocation10 + $0x44] sm:$0xf0]  ;;  %v1047_v60 = vld [vmem:[#allocation10 + $0xc0] sm:$0xf]  ;;  %v1217_v20 = vld [vmem:[#allocation10 + $0x34] sm:$0xf] }
  0x22   :  { %113 = vadd.xlane.f32.xlu0 %v112_v5  ;;  %448 = vmatpush.bf16.msra.mxu3 %v1068_v44  ;;  %v984_v62 = vor.u32 %v1220_v59, %v983_v58  ;;  %v1236_v63 = vld [vmem:[#allocation10 + $0xc4] sm:$0xf0]  ;;  %v1235_v5 = vld [vmem:[#allocation10 + $0xc4] sm:$0xf]  ;;  %v977_v23 = vld [vmem:[#allocation10 + $0x38] sm:$0xf0] }
  0x23   :  { %v1233_v24 = vld [vmem:[#allocation10 + $0xb4] sm:$0xf]  ;;  %v980_v26 = vor.u32 %v1217_v20, %v977_v23  ;;  %v967_v29 = vld [vmem:[#allocation10 + $0x20] sm:$0xf]  ;;  %v1216_v30 = vld [vmem:[#allocation10 + $0x24] sm:$0xf0] }
  0x24   :  { %407 = vmatpush.bf16.msra.mxu0 %v992_v48  ;;  %435 = vmatpush.bf16.msra.mxu2 %v996_v53  ;;  %v968_v32 = vor.u32 %v1216_v30, %v967_v29  ;;  %v1031_v33 = vld [vmem:[#allocation10 + $0xa0] sm:$0xf]  ;;  %v1232_v34 = vld [vmem:[#allocation10 + $0xa4] sm:$0xf0]  ;;  %v1215_v35 = vld [vmem:[#allocation10 + $0x24] sm:$0xf] }
  0x25   :  { %421 = vmatpush.bf16.msra.mxu1 %v1056_v52  ;;  %v1032_v37 = vor.u32 %v1232_v34, %v1031_v33  ;;  %v969_v38 = vld [vmem:[#allocation10 + $0x28] sm:$0xf0]  ;;  %v1231_v39 = vld [vmem:[#allocation10 + $0xa4] sm:$0xf]  ;;  %v959_v44 = vld [vmem:[#allocation10 + $0x10] sm:$0xf] }
  0x26   :  { %449 = vmatpush.bf16.msra.mxu3 %v1060_v57  ;;  %v1033_v40 = vld [vmem:[#allocation10 + $0xa8] sm:$0xf0]  ;;  %v972_v41 = vor.u32 %v1215_v35, %v969_v38  ;;  %v1214_v45 = vld [vmem:[#allocation10 + $0x14] sm:$0xf0]  ;;  %v1023_v47 = vld [vmem:[#allocation10 + $0x90] sm:$0xf] }
  0x27   :  { %v1036_v42 = vor.u32 %v1231_v39, %v1033_v40  ;;  %v960_v46 = vor.u32 %v1214_v45, %v959_v44  ;;  %v1230_v48 = vld [vmem:[#allocation10 + $0x94] sm:$0xf0]  ;;  %v1213_v49 = vld [vmem:[#allocation10 + $0x14] sm:$0xf]  ;;  %v961_v52 = vld [vmem:[#allocation10 + $0x18] sm:$0xf0] }
  0x28   :  { %408 = vmatpush.bf16.msra.mxu0 %v984_v62  ;;  %v1024_v51 = vor.u32 %v1230_v48, %v1023_v47  ;;  %v1229_v53 = vld [vmem:[#allocation10 + $0x94] sm:$0xf]  ;;  %v964_v54 = vor.u32 %v1213_v49, %v961_v52  ;;  %v1025_v55 = vld [vmem:[#allocation10 + $0x98] sm:$0xf0]  ;;  %v1212_v57 = vld [vmem:[#allocation10 + $0x4] sm:$0xf0] }
  0x29   :  { %v1015_v62 = vld [vmem:[#allocation10 + $0x80] sm:$0xf] }
  0x8d   :  { %v111_v6 = vpop.xlane.xlu0 %110 }
  0x8e   :  { %v115_v7 = vmul.f32 0.03125, %v111_v6  ;;  %v1049_v6 = vld [vmem:[#allocation10 + $0xc8] sm:$0xf0] }
  0x90   :  { %v1517_v8 = vsub.f32 %v105_v0, %v115_v7  ;;  %v1519_v9 = vsub.f32 %v106_v1, %v115_v7  ;;  %v131_v43 = vmul.f32 %v115_v7, %v115_v7  ;;  %v1219_v0 = vld [vmem:[#allocation10 + $0x44] sm:$0xf]  ;;  %v985_v1 = vld [vmem:[#allocation10 + $0x48] sm:$0xf0] }
  0x92   :  { %v121_v10 = vmul.f32 %v1517_v8, %v1517_v8  ;;  %v122_v11 = vmul.f32 %v1519_v9, %v1519_v9  ;;  %v133_v56 = vmul.f32 224.0, %v131_v43 }
  0x94   :  { %v125_v12 = vadd.f32 %v122_v11, %v121_v10  ;;  %v1052_v10 = vor.u32 %v1235_v5, %v1049_v6  ;;  %v1017_v6 = vld [vmem:[#allocation10 + $0x88] sm:$0xf0] }
  0x95   :  { %v114_v13 = vpop.xlane.xlu0 %113 }
  0x96   :  { %v1525_v14 = vmul.f32 0.03125, %v114_v13  ;;  %126 = vadd.xlane.f32.xlu1 %v125_v12  ;;  %v975_v12 = vld [vmem:[#allocation10 + $0x30] sm:$0xf]  ;;  %v1218_v13 = vld [vmem:[#allocation10 + $0x34] sm:$0xf0]  ;;  %450 = vmatpush.bf16.msra.mxu3 %v1052_v10 }
  0x98   :  { %v1528_v15 = vsub.f32 %v107_v3, %v1525_v14  ;;  %v1531_v16 = vsub.f32 %v108_v4, %v1525_v14  ;;  %v1048_v3 = vor.u32 %v1236_v63, %v1047_v60  ;;  %v988_v4 = vor.u32 %v1219_v0, %v985_v1  ;;  %v1228_v63 = vld [vmem:[#allocation10 + $0x84] sm:$0xf0] }
  0x99   :  { %v132_v7 = vmul.f32 %v1525_v14, %v1525_v14  ;;  %v1041_v14 = vld [vmem:[#allocation10 + $0xb8] sm:$0xf0]  ;;  %v1028_v60 = vor.u32 %v1229_v53, %v1025_v55  ;;  %v1016_v1 = vor.u32 %v1228_v63, %v1015_v62 }
  0x9a   :  { %v123_v17 = vmul.f32 %v1528_v15, %v1528_v15  ;;  %v124_v18 = vmul.f32 %v1531_v16, %v1531_v16  ;;  %422 = vmatpush.bf16.msra.mxu1 %v1048_v3  ;;  %436 = vmatpush.bf16.msra.mxu2 %v988_v4  ;;  %v1044_v28 = vor.u32 %v1233_v24, %v1041_v14  ;;  %v953_v3 = vld [vmem:[#allocation10 + $0x8] sm:$0xf0]  ;;  %v1227_v4 = vld [vmem:[#allocation10 + $0x84] sm:$0xf] }
  0x9b   :  { %v134_v25 = vmul.f32 224.0, %v132_v7  ;;  %v1020_v10 = vor.u32 %v1227_v4, %v1017_v6  ;;  %v1258_v4 = vld [vmem:[#allocation12 + $0x74] sm:$0xf0] }
  0x9c   :  { %v128_v19 = vadd.f32 %v124_v18, %v123_v17  ;;  %v976_v17 = vor.u32 %v1218_v13, %v975_v12  ;;  %v1039_v18 = vld [vmem:[#allocation10 + $0xb0] sm:$0xf]  ;;  %451 = vmatpush.bf16.msra.mxu3 %v1044_v28  ;;  %v167_v12 = vld [vmem:[#allocation7] sm:$0x3] }
  0x9e   :  { %129 = vadd.xlane.f32.xlu1 %v128_v19  ;;  %v1234_v19 = vld [vmem:[#allocation10 + $0xb4] sm:$0xf0]  ;;  %409 = vmatpush.bf16.msra.mxu0 %v976_v17 }
  0x9f   :  { %v1040_v22 = vor.u32 %v1234_v19, %v1039_v18  ;;  %437 = vmatpush.bf16.msra.mxu2 %v980_v26  ;;  %v177_v18 = vld [vmem:[#allocation9] sm:$0x3] }
  0xa0   :  { %452 = vmatpush.bf16.msra.mxu3 %v1036_v42  ;;  %v180_v26 = vperm.slane %v177_v18, 1 }
  0xa1   :  { %423 = vmatpush.bf16.msra.mxu1 %v1040_v22  ;;  %v170_v22 = vperm.slane %v167_v12, 1 }
  0xa2   :  { %410 = vmatpush.bf16.msra.mxu0 %v968_v32 }
  0xa3   :  { %438 = vmatpush.bf16.msra.mxu2 %v972_v41 }
  0xa4   :  { %453 = vmatpush.bf16.msra.mxu3 %v1028_v60 }
  0xa5   :  { %424 = vmatpush.bf16.msra.mxu1 %v1032_v37 }
  0xa6   :  { %411 = vmatpush.bf16.msra.mxu0 %v960_v46 }
  0xa7   :  { %439 = vmatpush.bf16.msra.mxu2 %v964_v54 }
  0xa8   :  { %454 = vmatpush.bf16.msra.mxu3 %v1020_v10 }
  0xa9   :  { %425 = vmatpush.bf16.msra.mxu1 %v1024_v51 }
  0xad   :  { %426 = vmatpush.bf16.msra.mxu1 %v1016_v1 }
 0x109   :  { %v127_v61 = vpop.xlane.xlu1 %126 }
 0x10a   :  { %v135_v2 = vsub.f32 %v127_v61, %v133_v56  ;;  %v951_v56 = vld [vmem:[#allocation10] sm:$0xf] }
 0x10b   :  { %v952_v61 = vor.u32 %v1212_v57, %v951_v56 }
 0x10c   :  { %v137_v11 = vmul.f32 0.03125, %v135_v2  ;;  %v1211_v2 = vld [vmem:[#allocation10 + $0x4] sm:$0xf] }
 0x10d   :  { %v956_v5 = vor.u32 %v1211_v2, %v953_v3  ;;  %412 = vmatpush.bf16.msra.mxu0 %v952_v61  ;;  %v1139_v2 = vld [vmem:[#allocation12 + $0x70] sm:$0xf] }
 0x10e   :  { %v139_v21 = vmax.f32 %v137_v11, 0.0 }
 0x10f   :  { %440 = vmatpush.bf16.msra.mxu2 %v956_v5 }
 0x110   :  { %v1539_v27 = vadd.f32 1e-05, %v139_v21  ;;  %v169_v21 = vperm.slane %v167_v12, 0  ;;  %v1257_v12 = vld [vmem:[#allocation12 + $0x74] sm:$0xf] }
 0x111   :  { %v130_v31 = vpop.xlane.xlu1 %129 }
 0x112   :  { %1285 = vrsqrt.f32 %v1539_v27  ;;  %v136_v36 = vsub.f32 %v130_v31, %v134_v25  ;;  %vm149_vm1 = vweird.f32 %v1539_v27  ;;  %v179_v25 = vperm.slane %v177_v18, 0 }
 0x114   :  { %v138_v43 = vmul.f32 0.03125, %v136_v36 }
 0x116   :  { %v140_v50 = vmax.f32 %v138_v43, 0.0 }
 0x118   :  { %v1286_v58 = vpop.eup %1285  ;;  %v142_v59 = vadd.f32 1e-05, %v140_v50 }
 0x119   :  { %v144_v0 = vmul.f32 %v1286_v58, %v1539_v27  ;;  %vm150_vm0 = vweird.f32 %v1286_v58 }
 0x11a   :  { %1287 = vrsqrt.f32 %v142_v59  ;;  %vm151_vm2 = vmor %vm149_vm1, %vm150_vm0  ;;  %vm159_vm4 = vweird.f32 %v142_v59 }
 0x11b   :  { %v145_v7 = vmul.f32 %v1286_v58, %v144_v0 }
 0x11d   :  { %v146_v11 = vmul.f32 0.5, %v145_v7  ;;  %v1140_v7 = vor.u32 %v1258_v4, %v1139_v2  ;;  %v1125_v4 = vld [vmem:[#allocation12 + $0x58] sm:$0xf0] }
 0x11f   :  { %v147_v13 = vsub.f32 1.5, %v146_v11  ;;  %835 = vmatpush.bf16.msrb.mxu0 %v1140_v7 }
 0x120   :  { %v1288_v17 = vpop.eup %1287 }
 0x121   :  { %v148_v19 = vmul.f32 %v1286_v58, %v147_v13  ;;  %v154_v20 = vmul.f32 %v1288_v17, %v142_v59  ;;  %vm160_vm3 = vweird.f32 %v1288_v17  ;;  %v1141_v13 = vld [vmem:[#allocation12 + $0x78] sm:$0xf0] }
 0x122   :  { %vm161_vm5 = vmor %vm159_vm4, %vm160_vm3 }
 0x123   :  { %v152_v23 = vsel %vm151_vm2, %v1286_v58, %v148_v19  ;;  %v155_v24 = vmul.f32 %v1288_v17, %v154_v20  ;;  %v1144_v20 = vor.u32 %v1257_v12, %v1141_v13  ;;  %v1272_v12 = vld [vmem:[#allocation12 + $0xe4] sm:$0xf0] }
 0x124   :  { %v163_v14 = vmul.f32 %v152_v23, %v1517_v8  ;;  %v164_v28 = vmul.f32 %v152_v23, %v1519_v9  ;;  %v1255_v23 = vld [vmem:[#allocation12 + $0x64] sm:$0xf] }
 0x125   :  { %v156_v29 = vmul.f32 0.5, %v155_v24  ;;  %863 = vmatpush.bf16.msrb.mxu2 %v1144_v20 }
 0x126   :  { %v173_v30 = vmul.f32 %v169_v21, %v163_v14  ;;  %v174_v31 = vmul.f32 %v170_v22, %v164_v28  ;;  %v1133_v28 = vld [vmem:[#allocation12 + $0x68] sm:$0xf0] }
 0x127   :  { %v157_v32 = vsub.f32 1.5, %v156_v29 }
 0x128   :  { %v183_v33 = vadd.f32 %v179_v25, %v173_v30  ;;  %v184_v34 = vadd.f32 %v180_v26, %v174_v31  ;;  %v1136_v31 = vor.u32 %v1255_v23, %v1133_v28 }
 0x129   :  { %v158_v27 = vmul.f32 %v1288_v17, %v157_v32  ;;  %v1203_v32 = vld [vmem:[#allocation12 + $0xf0] sm:$0xf] }
 0x12a   :  { %v187_v35 = vpack.c.bf16 %v184_v34, %v183_v33  ;;  %864 = vmatpush.bf16.msrb.mxu2 %v1136_v31 }
 0x12b   :  { %v162_v36 = vsel %vm161_vm5, %v1288_v17, %v158_v27 }
 0x12c   :  { %189 = vst [vmem:[#allocation2] sm:$0xff] %v187_v35  ;;  %v165_v37 = vmul.f32 %v162_v36, %v1528_v15  ;;  %v166_v38 = vmul.f32 %v162_v36, %v1531_v16  ;;  %v229_v15 = vld [vmem:[%s1722_s4] sm:$0x3] }
 0x12d   :  { %v231_v16 = vperm.slane %v229_v15, 0  ;;  %v232_v52 = vperm.slane %v229_v15, 1 }
 0x12e   :  { %v175_v8 = vmul.f32 %v169_v21, %v165_v37  ;;  %v176_v39 = vmul.f32 %v170_v22, %v166_v38  ;;  %v1131_v21 = vld [vmem:[#allocation12 + $0x60] sm:$0xf]  ;;  %v1256_v22 = vld [vmem:[#allocation12 + $0x64] sm:$0xf0] }
 0x12f   :  { %v1132_v14 = vor.u32 %v1256_v22, %v1131_v21 }
 0x130   :  { %v185_v9 = vadd.f32 %v179_v25, %v175_v8  ;;  %v186_v40 = vadd.f32 %v180_v26, %v176_v39  ;;  %v1274_v8 = vld [vmem:[#allocation12 + $0xf4] sm:$0xf0]  ;;  %v1273_v39 = vld [vmem:[#allocation12 + $0xf4] sm:$0xf] }
 0x131   :  { %836 = vmatpush.bf16.msrb.mxu0 %v1132_v14 }
 0x132   :  { %v188_v41 = vpack.c.bf16 %v186_v40, %v185_v9  ;;  %v1205_v9 = vld [vmem:[#allocation12 + $0xf8] sm:$0xf0] }
 0x133   :  { %v943_v42 = vld [vmem:[#allocation2] sm:$0xf]  ;;  %v1209_v44 = vld [vmem:[#allocation2 + $0x4] sm:$0xf] }
 0x134   :  { %190 = vst [vmem:[#allocation2 + $0x8] sm:$0xff] %v188_v41 }
 0x13b   :  { %v1210_v43 = vld [vmem:[#allocation2 + $0x4] sm:$0xf0]  ;;  %v945_v45 = vld [vmem:[#allocation2 + $0x8] sm:$0xf0] }
 0x13c   :  { %v944_v46 = vor.u32 %v1210_v43, %v943_v42  ;;  %v948_v47 = vor.u32 %v1209_v44, %v945_v45  ;;  %v1204_v43 = vor.u32 %v1274_v8, %v1203_v32 }
 0x13e   :  { %413 = vmatmul.bf16.vlgmr.msra.gmra.mxu0 %v944_v46  ;;  %427 = vmatmul.bf16.vlgmr.msra.gmra.mxu1 %v948_v47 }
 0x13f   :  { %441 = vmatmul.bf16.vlgmr.msra.gmra.mxu2 %v944_v46  ;;  %455 = vmatmul.bf16.vlgmr.msra.gmra.mxu3 %v948_v47  ;;  %v1208_v47 = vor.u32 %v1273_v39, %v1205_v9  ;;  %v1251_v9 = vld [vmem:[#allocation12 + $0x44] sm:$0xf] }
 0x140   :  { %849 = vmatpush.bf16.msrb.mxu1 %v1204_v43 }
 0x141   :  { %877 = vmatpush.bf16.msrb.mxu3 %v1208_v47  ;;  %v1270_v47 = vld [vmem:[#allocation12 + $0xd4] sm:$0xf0] }
 0x1bb   :  { %v414_v48 = vpop.f32.mrf.mxu0  ;;  %v428_v49 = vpop.f32.mrf.mxu1 }
 0x1bc   :  { %v415_v50 = vadd.f32 %v414_v48, %v231_v16  ;;  %v1123_v48 = vld [vmem:[#allocation12 + $0x50] sm:$0xf] }
 0x1be   :  { %v1551_v51 = vadd.f32 %v428_v49, %v415_v50 }
 0x1c0   :  { %v1554_v53 = vmul.f32 0.70710677, %v1551_v51 }
 0x1c2   :  { %v469_v54 = vmul.f32 %v1554_v53, %v1554_v53  ;;  %v442_v55 = vpop.f32.mrf.mxu2  ;;  %v456_v57 = vpop.f32.mrf.mxu3 }
 0x1c3   :  { %v443_v56 = vadd.f32 %v442_v55, %v232_v52  ;;  %v416_v58 = vpop.f32.mrf.mxu0  ;;  %v430_v62 = vpop.f32.mrf.mxu1  ;;  %v1254_v55 = vld [vmem:[#allocation12 + $0x54] sm:$0xf0] }
 0x1c4   :  { %v1558_v59 = vmin.f32 %v469_v54, 16.0  ;;  %v417_v60 = vadd.f32 %v416_v58, %v231_v16 }
 0x1c5   :  { %v1560_v61 = vadd.f32 %v456_v57, %v443_v56 }
 0x1c6   :  { %v471_v63 = vmul.f32 2.1237322e-06, %v1558_v59  ;;  %v482_v0 = vmul.f32 3.8918573e-05, %v1558_v59  ;;  %v1564_v1 = vadd.f32 %v430_v62, %v417_v60  ;;  %v1124_v60 = vor.u32 %v1254_v55, %v1123_v48  ;;  %v1253_v62 = vld [vmem:[#allocation12 + $0x54] sm:$0xf] }
 0x1c7   :  { %v1567_v3 = vmul.f32 0.70710677, %v1560_v61  ;;  %v1128_v7 = vor.u32 %v1253_v62, %v1125_v4  ;;  %v1250_v4 = vld [vmem:[#allocation12 + $0x34] sm:$0xf0] }
 0x1c8   :  { %v472_v5 = vadd.f32 0.00028619796, %v471_v63  ;;  %v483_v6 = vadd.f32 0.001143296, %v482_v0  ;;  %v1572_v11 = vmul.f32 0.70710677, %v1564_v1  ;;  %837 = vmatpush.bf16.msrb.mxu0 %v1124_v60 }
 0x1c9   :  { %v509_v10 = vmul.f32 %v1567_v3, %v1567_v3  ;;  %865 = vmatpush.bf16.msrb.mxu2 %v1128_v7 }
 0x1ca   :  { %v473_v17 = vmul.f32 %v472_v5, %v1558_v59  ;;  %v484_v18 = vmul.f32 %v483_v6, %v1558_v59  ;;  %v444_v19 = vpop.f32.mrf.mxu2  ;;  %v549_v25 = vmul.f32 %v1572_v11, %v1572_v11  ;;  %v458_v35 = vpop.f32.mrf.mxu3 }
 0x1cb   :  { %v1576_v24 = vmin.f32 %v509_v10, 16.0  ;;  %v445_v26 = vadd.f32 %v444_v19, %v232_v52  ;;  %v1195_v10 = vld [vmem:[#allocation12 + $0xe0] sm:$0xf] }
 0x1cc   :  { %v474_v29 = vadd.f32 0.0036580483, %v473_v17  ;;  %v485_v30 = vadd.f32 0.014752088, %v484_v18  ;;  %v1582_v27 = vmin.f32 %v549_v25, 16.0  ;;  %v1196_v22 = vor.u32 %v1272_v12, %v1195_v10 }
 0x1cd   :  { %v511_v33 = vmul.f32 2.1237322e-06, %v1576_v24  ;;  %v522_v34 = vmul.f32 3.8918573e-05, %v1576_v24  ;;  %v1586_v38 = vadd.f32 %v458_v35, %v445_v26  ;;  %v1115_v35 = vld [vmem:[#allocation12 + $0x40] sm:$0xf] }
 0x1ce   :  { %v475_v36 = vmul.f32 %v474_v29, %v1558_v59  ;;  %v486_v37 = vmul.f32 %v485_v30, %v1558_v59  ;;  %v551_v42 = vmul.f32 2.1237322e-06, %v1582_v27  ;;  %v562_v46 = vmul.f32 3.8918573e-05, %v1582_v27  ;;  %850 = vmatpush.bf16.msrb.mxu1 %v1196_v22  ;;  %v1271_v29 = vld [vmem:[#allocation12 + $0xe4] sm:$0xf] }
 0x1cf   :  { %v512_v40 = vadd.f32 0.00028619796, %v511_v33  ;;  %v523_v41 = vadd.f32 0.001143296, %v522_v34  ;;  %v1594_v54 = vmul.f32 0.70710677, %v1586_v38 }
 0x1d0   :  { %v476_v44 = vadd.f32 0.05243302, %v475_v36  ;;  %v487_v45 = vadd.f32 0.112945676, %v486_v37  ;;  %v552_v16 = vadd.f32 0.00028619796, %v551_v42 }
 0x1d1   :  { %v524_v15 = vmul.f32 %v523_v41, %v1576_v24  ;;  %v513_v50 = vmul.f32 %v512_v40, %v1576_v24  ;;  %v563_v52 = vadd.f32 0.001143296, %v562_v46  ;;  %v589_v2 = vmul.f32 %v1594_v54, %v1594_v54  ;;  %v1197_v30 = vld [vmem:[#allocation12 + $0xe8] sm:$0xf0]  ;;  %v1252_v36 = vld [vmem:[#allocation12 + $0x44] sm:$0xf0] }
 0x1d2   :  { %v488_v49 = vmul.f32 %v487_v45, %v1558_v59  ;;  %v477_v56 = vmul.f32 %v476_v44, %v1558_v59  ;;  %v553_v58 = vmul.f32 %v552_v16, %v1582_v27  ;;  %v1200_v39 = vor.u32 %v1271_v29, %v1197_v30  ;;  %v1117_v42 = vld [vmem:[#allocation12 + $0x48] sm:$0xf0]  ;;  %v1187_v46 = vld [vmem:[#allocation12 + $0xd0] sm:$0xf] }
 0x1d3   :  { %v525_v57 = vadd.f32 0.014752088, %v524_v15  ;;  %v564_v0 = vmul.f32 %v563_v52, %v1582_v27  ;;  %v1603_v18 = vmin.f32 %v589_v2, 16.0  ;;  %v514_v20 = vadd.f32 0.0036580483, %v513_v50 }
 0x1d4   :  { %v489_v63 = vadd.f32 0.4994258, %v488_v49  ;;  %v554_v6 = vadd.f32 0.0036580483, %v553_v58  ;;  %v478_v19 = vadd.f32 0.18741608, %v477_v56  ;;  %878 = vmatpush.bf16.msrb.mxu3 %v1200_v39  ;;  %v1120_v49 = vor.u32 %v1251_v9, %v1117_v42 }
 0x1d5   :  { %v526_v5 = vmul.f32 %v525_v57, %v1576_v24  ;;  %v565_v17 = vadd.f32 0.014752088, %v564_v0  ;;  %v591_v26 = vmul.f32 2.1237322e-06, %v1603_v18  ;;  %v602_v31 = vmul.f32 3.8918573e-05, %v1603_v18 }
 0x1d6   :  { %v490_v13 = vmul.f32 %v489_v63, %v1558_v59  ;;  %v555_v28 = vmul.f32 %v554_v6, %v1582_v27  ;;  %v479_v32 = vmul.f32 %v478_v19, %v1558_v59  ;;  %v515_v33 = vmul.f32 %v514_v20, %v1576_v24  ;;  %866 = vmatpush.bf16.msrb.mxu2 %v1120_v49  ;;  %v1269_v63 = vld [vmem:[#allocation12 + $0xd4] sm:$0xf]  ;;  %v1189_v0 = vld [vmem:[#allocation12 + $0xd8] sm:$0xf0]  ;;  %v1107_v2 = vld [vmem:[#allocation12 + $0x30] sm:$0xf] }
 0x1d7   :  { %v527_v21 = vadd.f32 0.112945676, %v526_v5  ;;  %v566_v25 = vmul.f32 %v565_v17, %v1582_v27  ;;  %v592_v8 = vadd.f32 0.00028619796, %v591_v26  ;;  %v603_v45 = vadd.f32 0.001143296, %v602_v31 }
 0x1d8   :  { %v1605_v23 = vadd.f32 1.0, %v490_v13  ;;  %v556_v41 = vadd.f32 0.05243302, %v555_v28  ;;  %v1116_v59 = vor.u32 %v1252_v36, %v1115_v35  ;;  %v1618_v15 = vadd.f32 1.1283791, %v479_v32 }
 0x1d9   :  { %v528_v14 = vmul.f32 %v527_v21, %v1576_v24  ;;  %v567_v37 = vadd.f32 0.112945676, %v566_v25  ;;  %v593_v44 = vmul.f32 %v592_v8, %v1603_v18  ;;  %v516_v16 = vadd.f32 0.05243302, %v515_v33  ;;  %v1249_v5 = vld [vmem:[#allocation12 + $0x34] sm:$0xf] }
 0x1da   :  { %1289 = vrcp.f32 %v1605_v23  ;;  %v501_v52 = vand.u32 2147483647, %v1605_v23  ;;  %v604_v56 = vmul.f32 %v603_v45, %v1603_v18  ;;  %838 = vmatpush.bf16.msrb.mxu0 %v1116_v59  ;;  %v1188_v57 = vor.u32 %v1270_v47, %v1187_v46  ;;  %v1109_v13 = vld [vmem:[#allocation12 + $0x38] sm:$0xf0]  ;;  %v1179_v20 = vld [vmem:[#allocation12 + $0xc0] sm:$0xf] }
 0x1db   :  { %v529_v34 = vadd.f32 0.4994258, %v528_v14  ;;  %v568_v43 = vmul.f32 %v567_v37, %v1582_v27  ;;  %v557_v60 = vmul.f32 %v556_v41, %v1582_v27  ;;  %v594_v62 = vadd.f32 0.0036580483, %v593_v44  ;;  %v1268_v21 = vld [vmem:[#allocation12 + $0xc4] sm:$0xf0] }
 0x1dc   :  { %851 = vmatpush.bf16.msrb.mxu1 %v1188_v57  ;;  %v517_v7 = vmul.f32 %v516_v16, %v1576_v24  ;;  %v605_v12 = vadd.f32 0.014752088, %v604_v56  ;;  %v503_v17 = vand.u32 2147483648, %v1605_v23  ;;  %v1192_v19 = vor.u32 %v1269_v63, %v1189_v0  ;;  %v1267_v32 = vld [vmem:[#allocation12 + $0xc4] sm:$0xf] }
 0x1dd   :  { %v530_v40 = vmul.f32 %v529_v34, %v1576_v24  ;;  %v569_v55 = vadd.f32 0.4994258, %v568_v43  ;;  %v558_v25 = vadd.f32 0.18741608, %v557_v60  ;;  %v595_v28 = vmul.f32 %v594_v62, %v1603_v18  ;;  %v1181_v33 = vld [vmem:[#allocation12 + $0xc8] sm:$0xf0] }
 0x1de   :  { %v606_v14 = vmul.f32 %v605_v12, %v1603_v18  ;;  %879 = vmatpush.bf16.msrb.mxu3 %v1192_v19  ;;  %v1108_v29 = vor.u32 %v1250_v4, %v1107_v2  ;;  %v1112_v30 = vor.u32 %v1249_v5, %v1109_v13  ;;  %v1180_v31 = vor.u32 %v1268_v21, %v1179_v20  ;;  %v1099_v37 = vld [vmem:[#allocation12 + $0x20] sm:$0xf]  ;;  %v1248_v8 = vld [vmem:[#allocation12 + $0x24] sm:$0xf0]  ;;  %v1247_v9 = vld [vmem:[#allocation12 + $0x24] sm:$0xf] }
 0x1df   :  { %v1620_v48 = vadd.f32 1.0, %v530_v40  ;;  %v570_v10 = vmul.f32 %v569_v55, %v1582_v27  ;;  %v518_v36 = vadd.f32 0.18741608, %v517_v7  ;;  %v1101_v40 = vld [vmem:[#allocation12 + $0x28] sm:$0xf0]  ;;  %vm497_vm7 = vweird.f32 %v1605_v23 }
 0x1e0   :  { %v1622_v50 = vpop.eup %1289  ;;  %839 = vmatpush.bf16.msrb.mxu0 %v1108_v29  ;;  %867 = vmatpush.bf16.msrb.mxu2 %v1112_v30  ;;  %v1171_v41 = vld [vmem:[#allocation12 + $0xb0] sm:$0xf]  ;;  %v607_v42 = vadd.f32 0.112945676, %v606_v14  ;;  %v1184_v43 = vor.u32 %v1267_v32, %v1181_v33  ;;  %v1266_v44 = vld [vmem:[#allocation12 + $0xb4] sm:$0xf0]  ;;  %v559_v16 = vmul.f32 %v558_v25, %v1582_v27  ;;  %v1104_v60 = vor.u32 %v1247_v9, %v1101_v40 }
 0x1e1   :  { %v493_v58 = vmul.f32 %v1622_v50, %v1605_v23  ;;  %1291 = vrcp.f32 %v1620_v48  ;;  %v1634_v26 = vadd.f32 1.0, %v570_v10  ;;  %vm498_vm6 = vweird.f32 %v1622_v50  ;;  %852 = vmatpush.bf16.msrb.mxu1 %v1180_v31  ;;  %v1265_v45 = vld [vmem:[#allocation12 + $0xb4] sm:$0xf]  ;;  %v1173_v55 = vld [vmem:[#allocation12 + $0xb8] sm:$0xf0] }
 0x1e2   :  { %vm1648_vm8 = vmor %vm497_vm7, %vm498_vm6  ;;  %v504_v46 = vor.u32 1.1754944e-38, %v503_v17  ;;  %v596_v49 = vadd.f32 0.05243302, %v595_v28  ;;  %v608_v57 = vmul.f32 %v607_v42, %v1603_v18  ;;  %880 = vmatpush.bf16.msrb.mxu3 %v1184_v43  ;;  %v1091_v62 = vld [vmem:[#allocation12 + $0x10] sm:$0xf]  ;;  %v1172_v2 = vor.u32 %v1266_v44, %v1171_v41 }
 0x1e3   :  { %v494_v6 = vsub.f32 1.0, %v493_v58  ;;  %1293 = vrcp.f32 %v1634_v26  ;;  %v1100_v58 = vor.u32 %v1248_v8, %v1099_v37  ;;  %v1246_v63 = vld [vmem:[#allocation12 + $0x14] sm:$0xf0]  ;;  %v1245_v0 = vld [vmem:[#allocation12 + $0x14] sm:$0xf]  ;;  %v1176_v4 = vor.u32 %v1265_v45, %v1173_v55 }
 0x1e4   :  { %v1093_v5 = vld [vmem:[#allocation12 + $0x18] sm:$0xf0]  ;;  %v1264_v7 = vld [vmem:[#allocation12 + $0xa4] sm:$0xf0]  ;;  %vm502_vm9 = vcmp.eq.f32.partialorder %v501_v52, 8.507059e+37  ;;  %868 = vmatpush.bf16.msrb.mxu2 %v1104_v60  ;;  %v481_v17 = vmul.f32 %v1618_v15, %v1554_v53  ;;  %v519_v31 = vmul.f32 %v518_v36, %v1576_v24  ;;  %v583_v15 = vand.u32 2147483648, %v1634_v26 }
 0x1e5   :  { %v495_v22 = vmul.f32 %v1622_v50, %v494_v6  ;;  %v1163_v6 = vld [vmem:[#allocation12 + $0xa0] sm:$0xf]  ;;  %v609_v10 = vadd.f32 0.4994258, %v608_v57  ;;  %840 = vmatpush.bf16.msrb.mxu0 %v1100_v58  ;;  %v1096_v12 = vor.u32 %v1245_v0, %v1093_v5  ;;  %v1263_v13 = vld [vmem:[#allocation12 + $0xa4] sm:$0xf]  ;;  %853 = vmatpush.bf16.msrb.mxu1 %v1172_v2  ;;  %v597_v32 = vmul.f32 %v596_v49, %v1603_v18 }
 0x1e6   :  { %v560_v20 = vadd.f32 1.1283791, %v559_v16  ;;  %v1083_v25 = vld [vmem:[#allocation12] sm:$0xf]  ;;  %881 = vmatpush.bf16.msrb.mxu3 %v1176_v4  ;;  %v1164_v14 = vor.u32 %v1264_v7, %v1163_v6  ;;  %v1244_v29 = vld [vmem:[#allocation12 + $0x4] sm:$0xf0]  ;;  %vm537_vm11 = vweird.f32 %v1620_v48  ;;  %vm577_vm13 = vweird.f32 %v1634_v26 }
 0x1e7   :  { %v1638_v34 = vpop.eup %1291  ;;  %v496_v35 = vadd.f32 %v1622_v50, %v495_v22  ;;  %v1165_v22 = vld [vmem:[#allocation12 + $0xa8] sm:$0xf0]  ;;  %v610_v52 = vmul.f32 %v609_v10, %v1603_v18  ;;  %v1243_v30 = vld [vmem:[#allocation12 + $0x4] sm:$0xf]  ;;  %v1262_v40 = vld [vmem:[#allocation12 + $0x94] sm:$0xf0] }
 0x1e8   :  { %v533_v39 = vmul.f32 %v1638_v34, %v1620_v48  ;;  %v1168_v28 = vor.u32 %v1263_v13, %v1165_v22  ;;  %v1085_v33 = vld [vmem:[#allocation12 + $0x8] sm:$0xf0]  ;;  %869 = vmatpush.bf16.msrb.mxu2 %v1096_v12  ;;  %v1261_v41 = vld [vmem:[#allocation12 + $0x94] sm:$0xf]  ;;  %v581_v24 = vand.u32 2147483647, %v1634_v26  ;;  %vm538_vm12 = vweird.f32 %v1638_v34 }
 0x1e9   :  { %v500_v56 = vsel %vm1648_vm8, %v1622_v50, %v496_v35  ;;  %v1657_v27 = vpop.eup %1293  ;;  %v1092_v50 = vor.u32 %v1246_v63, %v1091_v62  ;;  %v1155_v35 = vld [vmem:[#allocation12 + $0x90] sm:$0xf]  ;;  %v1670_v8 = vadd.f32 1.0, %v610_v52  ;;  %v1088_v9 = vor.u32 %v1243_v30, %v1085_v33  ;;  %854 = vmatpush.bf16.msrb.mxu1 %v1164_v14  ;;  %v1157_v43 = vld [vmem:[#allocation12 + $0x98] sm:$0xf0]  ;;  %vm1689_vm15 = vmor %vm537_vm11, %vm538_vm12 }
 0x1ea   :  { %v534_v47 = vsub.f32 1.0, %v533_v39  ;;  %v505_v19 = vsel %vm502_vm9, %v504_v46, %v500_v56  ;;  %v573_v21 = vmul.f32 %v1657_v27, %v1634_v26  ;;  %v1084_v39 = vor.u32 %v1244_v29, %v1083_v25  ;;  %882 = vmatpush.bf16.msrb.mxu3 %v1168_v28  ;;  %v1147_v45 = vld [vmem:[#allocation12 + $0x80] sm:$0xf]  ;;  %v1260_v59 = vld [vmem:[#allocation12 + $0x84] sm:$0xf0] }
 0x1eb   :  { %v506_v37 = vmul.f32 %v505_v19, %v481_v17  ;;  %841 = vmatpush.bf16.msrb.mxu0 %v1092_v50  ;;  %vm578_vm10 = vweird.f32 %v1657_v27  ;;  %v1156_v36 = vor.u32 %v1262_v40, %v1155_v35  ;;  %1295 = vrcp.f32 %v1670_v8  ;;  %v1259_v49 = vld [vmem:[#allocation12 + $0x84] sm:$0xf]  ;;  %v1149_v55 = vld [vmem:[#allocation12 + $0x88] sm:$0xf0] }
 0x1ec   :  { %v535_v23 = vmul.f32 %v1638_v34, %v534_v47  ;;  %v574_v53 = vsub.f32 1.0, %v573_v21  ;;  %v543_v46 = vand.u32 2147483648, %v1620_v48  ;;  %v1160_v16 = vor.u32 %v1261_v41, %v1157_v43  ;;  %vm579_vm14 = vmor %vm577_vm13, %vm578_vm10  ;;  %870 = vmatpush.bf16.msrb.mxu2 %v1088_v9 }
 0x1ed   :  { %v1077_v56 = vclamps-f32 %v506_v37, 1.0  ;;  %v541_v57 = vand.u32 2147483647, %v1620_v48  ;;  %v584_v58 = vor.u32 1.1754944e-38, %v583_v15  ;;  %v598_v60 = vadd.f32 0.18741608, %v597_v32  ;;  %855 = vmatpush.bf16.msrb.mxu1 %v1156_v36 }
 0x1ee   :  { %v575_v42 = vmul.f32 %v1657_v27, %v574_v53  ;;  %v536_v44 = vadd.f32 %v1638_v34, %v535_v23  ;;  %v561_v26 = vmul.f32 %v560_v20, %v1572_v11  ;;  %vm582_vm0 = vcmp.eq.f32.partialorder %v581_v24, 8.507059e+37  ;;  %883 = vmatpush.bf16.msrb.mxu3 %v1160_v16 }
 0x1ef   :  { %842 = vmatpush.bf16.msrb.mxu0 %v1084_v39  ;;  %v1148_v0 = vor.u32 %v1260_v59, %v1147_v45  ;;  %v520_v2 = vadd.f32 1.1283791, %v519_v31  ;;  %v1152_v6 = vor.u32 %v1259_v49, %v1149_v55  ;;  %v544_v48 = vor.u32 1.1754944e-38, %v543_v46 }
 0x1f0   :  { %v576_v47 = vadd.f32 %v1657_v27, %v575_v42  ;;  %v540_v4 = vsel %vm1689_vm15, %v1638_v34, %v536_v44  ;;  %v629_v50 = vadd.f32 1.0, %v1077_v56  ;;  %vm542_vm1 = vcmp.eq.f32.partialorder %v541_v57, 8.507059e+37 }
 0x1f1   :  { %v1296_v10 = vpop.eup %1295  ;;  %v599_v11 = vmul.f32 %v598_v60, %v1603_v18  ;;  %v545_v12 = vsel %vm542_vm1, %v544_v48, %v540_v4  ;;  %856 = vmatpush.bf16.msrb.mxu1 %v1148_v0  ;;  %v461_v17 = vmul.f32 0.5, %v1551_v51  ;;  %v521_v19 = vmul.f32 %v520_v2, %v1567_v3 }
 0x1f2   :  { %v580_v63 = vsel %vm579_vm14, %v1657_v27, %v576_v47  ;;  %v613_v13 = vmul.f32 %v1296_v10, %v1670_v8  ;;  %884 = vmatpush.bf16.msrb.mxu3 %v1152_v6  ;;  %v463_v34 = vmul.f32 0.5, %v1564_v1  ;;  %v623_v52 = vand.u32 2147483648, %v1670_v8 }
 0x1f3   :  { %v585_v5 = vsel %vm582_vm0, %v584_v58, %v580_v63  ;;  %v633_v22 = vmul.f32 %v629_v50, %v461_v17  ;;  %v546_v25 = vmul.f32 %v545_v12, %v521_v19  ;;  %v600_v23 = vadd.f32 1.1283791, %v599_v11 }
 0x1f4   :  { %v586_v7 = vmul.f32 %v585_v5, %v561_v26  ;;  %v614_v21 = vsub.f32 1.0, %v613_v13  ;;  %vm618_vm2 = vweird.f32 %v1296_v10  ;;  %v621_v28 = vand.u32 2147483647, %v1670_v8 }
 0x1f5   :  { %vm617_vm3 = vweird.f32 %v1670_v8  ;;  %v624_v3 = vor.u32 1.1754944e-38, %v623_v52  ;;  %v1078_v30 = vclamps-f32 %v546_v25, 1.0  ;;  %v601_v1 = vmul.f32 %v600_v23, %v1594_v54  ;;  %v906_v54 = vld [vmem:[%s1724_s6] sm:$0x3]  ;;  %s1458_s6 = smov [#allocation13]  }
 0x1f6   :  { %v1079_v27 = vclamps-f32 %v586_v7, 1.0  ;;  %v615_v14 = vmul.f32 %v1296_v10, %v614_v21  ;;  %vm619_vm4 = vmor %vm617_vm3, %vm618_vm2  ;;  %vm622_vm5 = vcmp.eq.f32.partialorder %v621_v28, 8.507059e+37  ;;  %v462_v35 = vmul.f32 0.5, %v1560_v61  ;;  %s924_s28 = sshll.u32 %s1458_s6, 4  ;;  %s925_s28 = int_to_ptr.vmem [resolvable:$true] %s924_s28 }
 0x1f7   :  { %v630_v32 = vadd.f32 1.0, %v1078_v30  ;;  %v464_v37 = vmul.f32 0.5, %v1586_v38  ;;  %v908_v42 = vperm.slane %v906_v54, 0  ;;  %v909_v61 = vperm.slane %v906_v54, 1 }
 0x1f8   :  { %v631_v20 = vadd.f32 1.0, %v1079_v27  ;;  %v616_v29 = vadd.f32 %v1296_v10, %v615_v14 }
 0x1f9   :  { %v634_v8 = vmul.f32 %v630_v32, %v462_v35 }
 0x1fa   :  { %v635_v18 = vmul.f32 %v631_v20, %v463_v34  ;;  %v620_v31 = vsel %vm619_vm4, %v1296_v10, %v616_v29 }
 0x1fb   :  { %v625_v53 = vsel %vm622_vm5, %v624_v3, %v620_v31 }
 0x1fc   :  { %v641_v51 = vpack.c.bf16 %v635_v18, %v633_v22  ;;  %v626_v15 = vmul.f32 %v625_v53, %v601_v1 }
 0x1fe   :  { %843 = vmatmul.bf16.vlgmr.msrb.gmra.mxu0 %v641_v51  ;;  %871 = vmatmul.bf16.vlgmr.msrb.gmra.mxu2 %v641_v51  ;;  %v1080_v33 = vclamps-f32 %v626_v15, 1.0 }
 0x200   :  { %v632_v39 = vadd.f32 1.0, %v1080_v33 }
 0x202   :  { %v636_v9 = vmul.f32 %v632_v39, %v464_v37 }
 0x204   :  { %v642_v40 = vpack.c.bf16 %v636_v9, %v634_v8 }
 0x206   :  { %857 = vmatmul.bf16.vlgmr.msrb.gmra.mxu1 %v642_v40  ;;  %885 = vmatmul.bf16.vlgmr.msrb.gmra.mxu3 %v642_v40 }
 0x27b   :  { %v844_v41 = vpop.f32.mrf.mxu0 }
 0x281   :  { %v872_v44 = vpop.f32.mrf.mxu2 }
 0x283   :  { %v858_v24 = vpop.f32.mrf.mxu1  ;;  %v846_v59 = vpop.f32.mrf.mxu0 }
 0x284   :  { %v859_v36 = vadd.f32 %v858_v24, %v844_v41 }
 0x286   :  { %v912_v43 = vadd.f32 %v908_v42, %v859_v36 }
 0x288   :  { %916 = vst [vmem:[#allocation13] sm:$0xff] %v912_v43 }
 0x289   :  { %v886_v45 = vpop.f32.mrf.mxu3  ;;  %v874_v55 = vpop.f32.mrf.mxu2 }
 0x28a   :  { %v887_v38 = vadd.f32 %v886_v45, %v872_v44 }
 0x28b   :  { %v860_v46 = vpop.f32.mrf.mxu1 }
 0x28c   :  { %v913_v47 = vadd.f32 %v909_v61, %v887_v38  ;;  %v861_v16 = vadd.f32 %v860_v46, %v846_v59 }
 0x28e   :  { %917 = vst [vmem:[#allocation13 + $0x8] sm:$0xff] %v913_v47  ;;  %v914_v49 = vadd.f32 %v908_v42, %v861_v16 }
 0x290   :  { %918 = vst [vmem:[#allocation13 + $0x10] sm:$0xff] %v914_v49 }
 0x291   :  { %v888_v56 = vpop.f32.mrf.mxu3 }
 0x292   :  { %v889_v57 = vadd.f32 %v888_v56, %v874_v55 }
 0x294   :  { %v915_v58 = vadd.f32 %v909_v61, %v889_v57 }
 0x296   :  { %919 = vst [vmem:[#allocation13 + $0x18] sm:$0xff] %v915_v58 }
 0x297   :  { %932 = dma.vmem_to_hbm [thread:$0]  %s925_s28, 512, %s927_s8, [#allocation6], %s1454_s19, %s1454_s19, %s1455_s20  }
 0x298   :  { %1447 = dma.done.wait [#allocation6], 512  }
 0x299   :  { %1448 = vsyncadd [#allocation6], 4294966784 }
 0x29a   :  { %937 = vsyncpa [#allocation5], 1 }
 0x29b   :  { %938 = vsyncpa [#allocation8], 1 }
 0x29c   :  { %939 = vsyncpa [#allocation11], 1 }
 0x29d   :  { %940 = vsyncpa [#allocation6], 1 }

</bundles_post_ra>
